<compile_context>
chip_gen: v5e
topology: v5e:2x2
jax: 0.10.0
libtpu: 0.0.40
codegen_flags: <defaults>
</compile_context>

<pallas_src>
import functools

import jax
import jax.numpy as jnp
from jax.experimental import pallas as pl
from jax.experimental.pallas import tpu as pltpu

LATENT_DIM = 15          # latent state dimension D
IN_DIM = LATENT_DIM + 1  # D + 1 (time channel)
HIDDEN_DIM = 32          # hidden width of latent_odefunc MLP
BLOCK_M = 1024           # max rows per grid step when batched


def _round_up(n, m):
    return ((n + m - 1) // m) * m


def _tile(m, block_m):
    """Pick (tm, m_pad). Single full block when it fits (no pad ops);
    otherwise a sublane-aligned tile that yields >= 2 grid steps (v7x 2-TC)."""
    if m <= block_m:
        return m, m
    tm = min(block_m, _round_up(pl.cdiv(m, 2), 8))
    return tm, _round_up(m, tm)


# ----------------------------------------------------------------------------
# Kernels
# ----------------------------------------------------------------------------
def _enc_odefunc_kernel(x_ref, t_ref, w1x_ref, w1t_ref, b1_ref, w2_ref, b2_ref,
                        out_ref):
    # x_ref  : (TM, D)    t_ref: (TM, 1)
    # w1x_ref: (D, H)     w1t_ref/b1_ref: (1, H)
    # w2_ref : (H, D)     b2_ref: (1, D)
    # out_ref: (TM, D)
    x = x_ref[...]
    # First layer: MXU matmul for the x part; the time channel of the fused
    # torch.cat([x, t], -1) @ W1 is a VPU broadcast-FMA.
    h = jnp.dot(x.astype(w1x_ref.dtype), w1x_ref[...],
                preferred_element_type=jnp.float32)
    h = jnp.tanh(h + t_ref[...] * w1t_ref[...] + b1_ref[...])   # f32 EUP tanh
    # Second layer.
    y = jnp.dot(h.astype(w2_ref.dtype), w2_ref[...],
                preferred_element_type=jnp.float32)
    out_ref[...] = (y + b2_ref[...]).astype(out_ref.dtype)


def _fused_euler_kernel(t0_ref, dt_ref, x0_ref, w1x_ref, w1t_ref, b1_ref,
                        w2_ref, b2_ref, out_ref, *, num_steps):
    # Fixed-step Euler integration of dx/dt = f(t, x) fully inside one kernel:
    # weights stay VMEM-resident across the whole fori_loop.
    w1x = w1x_ref[...]
    w1t = w1t_ref[...]
    b1 = b1_ref[...]
    w2 = w2_ref[...]
    b2 = b2_ref[...]
    t0 = t0_ref[...]            # (1, 1)
    dt = dt_ref[...]            # (1, 1)

    def f(t, x):
        h = jnp.dot(x.astype(w1x.dtype), w1x,
                    preferred_element_type=jnp.float32)
        h = jnp.tanh(h + t * w1t + b1)
        return jnp.dot(h.astype(w2.dtype), w2,
                       preferred_element_type=jnp.float32) + b2

    def step(i, x):
        t = t0 + i.astype(jnp.float32) * dt
        return x + dt * f(t, x)

    x = jax.lax.fori_loop(0, num_steps, step, x0_ref[...].astype(jnp.float32))
    out_ref[...] = x.astype(out_ref.dtype)


# ----------------------------------------------------------------------------
# Wrappers
# ----------------------------------------------------------------------------
def enc_odefunc_forward_batched(t, x, params, *, block_m=BLOCK_M):
    """Evaluate the ODE function on a stack of (t_i, x_i) pairs.

    t : scalar or (M,)   -- time value(s)
    x : (M, LATENT_DIM)  float32
    returns (M, LATENT_DIM) float32
    """
    w1x, w1t, b1, w2, b2 = params
    m, d = x.shape
    assert d == LATENT_DIM
    t = jnp.broadcast_to(jnp.reshape(jnp.asarray(t, x.dtype), (-1, 1)), (m, 1))

    tm, m_pad = _tile(m, block_m)
    xp, tp = x, t
    if m_pad != m:
        xp = jnp.pad(x, ((0, m_pad - m), (0, 0)))
        tp = jnp.pad(t, ((0, m_pad - m), (0, 0)))

    weight_bytes = sum(int(a.size) * a.dtype.itemsize for a in
                       (w1x, w1t, b1, w2, b2))
    cost = pl.CostEstimate(
        flops=2 * m_pad * HIDDEN_DIM * (LATENT_DIM + LATENT_DIM),
        transcendentals=m_pad * HIDDEN_DIM,
        bytes_accessed=4 * m_pad * (LATENT_DIM + 1 + LATENT_DIM) + weight_bytes,
    )

    out = pl.pallas_call(
        _enc_odefunc_kernel,
        out_shape=jax.ShapeDtypeStruct((m_pad, LATENT_DIM), jnp.float32),
        grid=(m_pad // tm,),
        in_specs=[
            pl.BlockSpec((tm, LATENT_DIM), lambda i: (i, 0)),          # x
            pl.BlockSpec((tm, 1), lambda i: (i, 0)),                   # t
            pl.BlockSpec((LATENT_DIM, HIDDEN_DIM), lambda i: (0, 0)),  # W1_x
            pl.BlockSpec((1, HIDDEN_DIM), lambda i: (0, 0)),           # w1_t
            pl.BlockSpec((1, HIDDEN_DIM), lambda i: (0, 0)),           # b1
            pl.BlockSpec((HIDDEN_DIM, LATENT_DIM), lambda i: (0, 0)),  # W2
            pl.BlockSpec((1, LATENT_DIM), lambda i: (0, 0)),           # b2
        ],
        out_specs=pl.BlockSpec((tm, LATENT_DIM), lambda i: (i, 0)),
        compiler_params=pltpu.CompilerParams(
            dimension_semantics=("parallel",)),
        cost_estimate=cost,
    )(xp, tp, w1x, w1t, b1, w2, b2)

    if m_pad != m:
        out = out[:m]
    return out


def enc_odefunc_forward(t, x, params):
    """Exact equivalent of EncODEFunc.forward(t, x): scalar t, x of shape (1, D)."""
    return enc_odefunc_forward_batched(t, x, params)


def enc_odefunc_euler_solve(t0, dt, num_steps, x0, params):
    """Fused fixed-step Euler solve: x_{i+1} = x_i + dt * EncODEFunc(t0+i*dt, x_i),
    run entirely inside one pallas_call (weights VMEM-resident)."""
    w1x, w1t, b1, w2, b2 = params
    m, d = x0.shape
    assert d == LATENT_DIM
    t0a = jnp.reshape(jnp.asarray(t0, jnp.float32), (1, 1))
    dta = jnp.reshape(jnp.asarray(dt, jnp.float32), (1, 1))
    kernel = functools.partial(_fused_euler_kernel, num_steps=num_steps)
    return pl.pallas_call(
        kernel,
        out_shape=jax.ShapeDtypeStruct((m, LATENT_DIM), jnp.float32),
    )(t0a, dta, x0, w1x, w1t, b1, w2, b2)


# ----------------------------------------------------------------------------
# Parameters
# ----------------------------------------------------------------------------
def init_params(key):
    """nn.Linear-style init; weights stored (in, out) so the kernel does x @ W."""
    k1, k2, k3, k4 = jax.random.split(key, 4)
    lim1 = 1.0 / jnp.sqrt(IN_DIM)
    lim2 = 1.0 / jnp.sqrt(HIDDEN_DIM)
    w1 = jax.random.uniform(k1, (IN_DIM, HIDDEN_DIM), jnp.float32, -lim1, lim1)
    b1 = jax.random.uniform(k2, (1, HIDDEN_DIM), jnp.float32, -lim1, lim1)
    w2 = jax.random.uniform(k3, (HIDDEN_DIM, LATENT_DIM), jnp.float32, -lim2, lim2)
    b2 = jax.random.uniform(k4, (1, LATENT_DIM), jnp.float32, -lim2, lim2)
    return w1, b1, w2, b2


def prepare_params(raw_params, *, use_bf16=False):
    """Split the time row out of W1; optionally pre-cast MXU weights to bf16
    (done once, outside the hot path). Biases / time row stay f32 for the VPU."""
    w1, b1, w2, b2 = raw_params
    mxu = jnp.bfloat16 if use_bf16 else jnp.float32
    w1x = w1[:LATENT_DIM, :].astype(mxu)
    w1t = jnp.reshape(w1[LATENT_DIM, :], (1, HIDDEN_DIM)).astype(jnp.float32)
    b1p = jnp.reshape(b1, (1, HIDDEN_DIM)).astype(jnp.float32)
    w2p = w2.astype(mxu)
    b2p = jnp.reshape(b2, (1, LATENT_DIM)).astype(jnp.float32)
    return w1x, w1t, b1p, w2p, b2p


# ----------------------------------------------------------------------------
# Pure-JAX references (mirror the PyTorch concat form exactly)
# ----------------------------------------------------------------------------
def _reference_forward(t_rows, x, raw_params):
    w1, b1, w2, b2 = raw_params
    t_col = jnp.broadcast_to(
        jnp.reshape(jnp.asarray(t_rows, x.dtype), (-1, 1)), (x.shape[0], 1))
    xt = jnp.concatenate([x, t_col], axis=-1)
    hi = jax.lax.Precision.HIGHEST
    h = jnp.tanh(jnp.dot(xt, w1, precision=hi) + b1)
    return jnp.dot(h, w2, precision=hi) + b2


def _reference_euler(t0, dt, num_steps, x0, raw_params):
    x = x0
    for i in range(num_steps):
        t = t0 + i * dt
        x = x + dt * _reference_forward(t, x, raw_params)
    return x


# ----------------------------------------------------------------------------
if __name__ == "__main__":
    key = jax.random.PRNGKey(0)
    kp, kx, kt = jax.random.split(key, 3)

    raw_params = init_params(kp)
    params_f32 = prepare_params(raw_params)
    params_bf16 = prepare_params(raw_params, use_bf16=True)

    # --- Case 1: exact original module semantics (scalar t, x of shape (1, D)).
    x1 = jax.random.normal(kx, (1, LATENT_DIM), jnp.float32)
    t1 = jax.random.uniform(kt, (), jnp.float32)
    out1 = jax.block_until_ready(enc_odefunc_forward(t1, x1, params_f32))
    ref1 = _reference_forward(t1, x1, raw_params)
    assert out1.shape == (1, LATENT_DIM)
    assert jnp.allclose(out1, ref1, atol=1e-4, rtol=1e-4), "single-eval mismatch"

    # --- Case 2: batched evaluations (single full-block path, no padding).
    M = 64
    kx2, kt2 = jax.random.split(kx)
    xb = jax.random.normal(kx2, (M, LATENT_DIM), jnp.float32)
    tb = jax.random.uniform(kt2, (M,), jnp.float32)
    outb = jax.block_until_ready(enc_odefunc_forward_batched(tb, xb, params_f32))
    refb = _reference_forward(tb, xb, raw_params)
    assert outb.shape == (M, LATENT_DIM)
    assert jnp.allclose(outb, refb, atol=1e-4, rtol=1e-4), "batched mismatch"

    # --- Case 3: multi-block grid + row padding path (small block_m override).
    M3 = 40
    xb3 = jax.random.normal(jax.random.fold_in(kx2, 3), (M3, LATENT_DIM),
                            jnp.float32)
    tb3 = jax.random.uniform(jax.random.fold_in(kt2, 3), (M3,), jnp.float32)
    outb3 = jax.block_until_ready(
        enc_odefunc_forward_batched(tb3, xb3, params_f32, block_m=16))
    refb3 = _reference_forward(tb3, xb3, raw_params)
    assert outb3.shape == (M3, LATENT_DIM)
    assert jnp.allclose(outb3, refb3, atol=1e-4, rtol=1e-4), "tiled mismatch"

    # --- Case 4: bf16 MXU weights (pre-cast), f32 accumulation + f32 tanh.
    outb16 = jax.block_until_ready(
        enc_odefunc_forward_batched(tb, xb, params_bf16))
    assert jnp.allclose(outb16, refb, atol=5e-2, rtol=5e-2), "bf16 mismatch"

    # --- Case 5: fused fixed-step Euler solver (one pallas_call, weights
    #             VMEM-resident across the whole integration).
    M5, STEPS = 8, 16
    x0 = jax.random.normal(jax.random.fold_in(kx, 5), (M5, LATENT_DIM),
                           jnp.float32)
    t0, dt = 0.0, 1.0 / 16.0
    out5 = jax.block_until_ready(
        enc_odefunc_euler_solve(t0, dt, STEPS, x0, params_f32))
    ref5 = _reference_euler(t0, dt, STEPS, x0, raw_params)
    assert out5.shape == (M5, LATENT_DIM)
    assert jnp.allclose(out5, ref5, atol=1e-3, rtol=1e-3), "fused-solver mismatch"

    print("KERNEL_OK")
</pallas_src>

<mosaic_0001>
module attributes {stable_mosaic.version = 11 : i64} {
  func.func @_enc_odefunc_kernel(%arg0: i32, %arg1: memref<1x15xf32, #tpu.memory_space<vmem>>, %arg2: memref<1x1xf32, #tpu.memory_space<vmem>>, %arg3: memref<15x32xf32, #tpu.memory_space<vmem>>, %arg4: memref<1x32xf32, #tpu.memory_space<vmem>>, %arg5: memref<1x32xf32, #tpu.memory_space<vmem>>, %arg6: memref<32x15xf32, #tpu.memory_space<vmem>>, %arg7: memref<1x15xf32, #tpu.memory_space<vmem>>, %arg8: memref<1x15xf32, #tpu.memory_space<vmem>>) attributes {dimension_semantics = [#tpu.dimension_semantics<parallel>], iteration_bounds = array<i64: 1>, scalar_prefetch = 0 : i64, scratch_operands = 0 : i64, tpu.core_type = #tpu.core_type<tc>, window_params = [{transform_indices = @transform_0, window_bounds = array<i64: 1, 15>}, {transform_indices = @transform_1, window_bounds = array<i64: 1, 1>}, {pipeline_mode = #tpu.pipeline_mode<synchronous>, transform_indices = @transform_2, window_bounds = array<i64: 15, 32>}, {pipeline_mode = #tpu.pipeline_mode<synchronous>, transform_indices = @transform_3, window_bounds = array<i64: 1, 32>}, {pipeline_mode = #tpu.pipeline_mode<synchronous>, transform_indices = @transform_4, window_bounds = array<i64: 1, 32>}, {pipeline_mode = #tpu.pipeline_mode<synchronous>, transform_indices = @transform_5, window_bounds = array<i64: 32, 15>}, {pipeline_mode = #tpu.pipeline_mode<synchronous>, transform_indices = @transform_6, window_bounds = array<i64: 1, 15>}, {transform_indices = @transform_7, window_bounds = array<i64: 1, 15>}]} {
    %c0 = arith.constant 0 : index
    %c0_0 = arith.constant 0 : index
    %0 = vector.load %arg1[%c0, %c0_0] : memref<1x15xf32, #tpu.memory_space<vmem>>, vector<1x15xf32>
    %c0_1 = arith.constant 0 : index
    %c0_2 = arith.constant 0 : index
    %1 = vector.load %arg3[%c0_1, %c0_2] : memref<15x32xf32, #tpu.memory_space<vmem>>, vector<15x32xf32>
    %cst = arith.constant dense<0.000000e+00> : vector<1x32xf32>
    %2 = tpu.matmul %0, %1, %cst {dimension_numbers = #tpu.dot_dimension_numbers<[1], [0], [0], [1], [0, 0, 1, 1], [], []>} : vector<1x15xf32>, vector<15x32xf32>, vector<1x32xf32> -> vector<1x32xf32>
    %c0_3 = arith.constant 0 : index
    %c0_4 = arith.constant 0 : index
    %3 = vector.load %arg2[%c0_3, %c0_4] : memref<1x1xf32, #tpu.memory_space<vmem>>, vector<1x1xf32>
    %c0_5 = arith.constant 0 : index
    %c0_6 = arith.constant 0 : index
    %4 = vector.load %arg4[%c0_5, %c0_6] : memref<1x32xf32, #tpu.memory_space<vmem>>, vector<1x32xf32>
    %5 = vector.broadcast %3 : vector<1x1xf32> to vector<1x32xf32>
    %6 = arith.mulf %5, %4 : vector<1x32xf32>
    %7 = arith.addf %2, %6 : vector<1x32xf32>
    %c0_7 = arith.constant 0 : index
    %c0_8 = arith.constant 0 : index
    %8 = vector.load %arg5[%c0_7, %c0_8] : memref<1x32xf32, #tpu.memory_space<vmem>>, vector<1x32xf32>
    %9 = arith.addf %7, %8 : vector<1x32xf32>
    %10 = math.tanh %9 : vector<1x32xf32>
    %c0_9 = arith.constant 0 : index
    %c0_10 = arith.constant 0 : index
    %11 = vector.load %arg6[%c0_9, %c0_10] : memref<32x15xf32, #tpu.memory_space<vmem>>, vector<32x15xf32>
    %cst_11 = arith.constant dense<0.000000e+00> : vector<1x15xf32>
    %12 = tpu.matmul %10, %11, %cst_11 {dimension_numbers = #tpu.dot_dimension_numbers<[1], [0], [0], [1], [0, 0, 1, 1], [], []>} : vector<1x32xf32>, vector<32x15xf32>, vector<1x15xf32> -> vector<1x15xf32>
    %c0_12 = arith.constant 0 : index
    %c0_13 = arith.constant 0 : index
    %13 = vector.load %arg7[%c0_12, %c0_13] : memref<1x15xf32, #tpu.memory_space<vmem>>, vector<1x15xf32>
    %14 = arith.addf %12, %13 : vector<1x15xf32>
    %c0_14 = arith.constant 0 : index
    %c0_15 = arith.constant 0 : index
    %15 = vector.load %arg8[%c0_14, %c0_15] : memref<1x15xf32, #tpu.memory_space<vmem>>, vector<1x15xf32>
    tpu.vector_store %arg8[%c0_14, %c0_15], %14 {strides = array<i32>} : memref<1x15xf32, #tpu.memory_space<vmem>>, vector<1x15xf32>,
    return
  }
  func.func @transform_0(%arg0: i32) -> (i32, i32) {
    %c0_i32 = arith.constant 0 : i32
    %c0_i32_0 = arith.constant 0 : i32
    return %arg0, %c0_i32 : i32, i32
  }
  func.func @transform_1(%arg0: i32) -> (i32, i32) {
    %c0_i32 = arith.constant 0 : i32
    %c0_i32_0 = arith.constant 0 : i32
    return %arg0, %c0_i32 : i32, i32
  }
  func.func @transform_2(%arg0: i32) -> (i32, i32) {
    %c0_i32 = arith.constant 0 : i32
    %c0_i32_0 = arith.constant 0 : i32
    %c0_i32_1 = arith.constant 0 : i32
    return %c0_i32, %c0_i32_0 : i32, i32
  }
  func.func @transform_3(%arg0: i32) -> (i32, i32) {
    %c0_i32 = arith.constant 0 : i32
    %c0_i32_0 = arith.constant 0 : i32
    %c0_i32_1 = arith.constant 0 : i32
    return %c0_i32, %c0_i32_0 : i32, i32
  }
  func.func @transform_4(%arg0: i32) -> (i32, i32) {
    %c0_i32 = arith.constant 0 : i32
    %c0_i32_0 = arith.constant 0 : i32
    %c0_i32_1 = arith.constant 0 : i32
    return %c0_i32, %c0_i32_0 : i32, i32
  }
  func.func @transform_5(%arg0: i32) -> (i32, i32) {
    %c0_i32 = arith.constant 0 : i32
    %c0_i32_0 = arith.constant 0 : i32
    %c0_i32_1 = arith.constant 0 : i32
    return %c0_i32, %c0_i32_0 : i32, i32
  }
  func.func @transform_6(%arg0: i32) -> (i32, i32) {
    %c0_i32 = arith.constant 0 : i32
    %c0_i32_0 = arith.constant 0 : i32
    %c0_i32_1 = arith.constant 0 : i32
    return %c0_i32, %c0_i32_0 : i32, i32
  }
  func.func @transform_7(%arg0: i32) -> (i32, i32) {
    %c0_i32 = arith.constant 0 : i32
    %c0_i32_0 = arith.constant 0 : i32
    return %arg0, %c0_i32 : i32, i32
  }
}

</mosaic_0001>

<bundles_post_ra>
// kernel: tpu_custom_call.1
= control target key start
LH: loop header
LB: loop body
LE: loop exit
PB: predicated region body
PF: predicated region fallthrough
CT: control target
= control target key end

     0   :  { %s231_s0 = inlined_call_operand.vmem [shape: f32[1,15], index: 0, kind: input, shape index: {}]   ;;  %s232_s1 = inlined_call_operand.<no memory space> [shape: f32[1,1], index: 1, kind: input, shape index: {}]   ;;  %s233_s2 = inlined_call_operand.vmem [shape: f32[15,32], index: 2, kind: input, shape index: {}]   ;;  %s234_s3 = inlined_call_operand.vmem [shape: f32[1,32], index: 3, kind: input, shape index: {}]   ;;  %s235_s4 = inlined_call_operand.vmem [shape: f32[1,32], index: 4, kind: input, shape index: {}]   ;;  %s236_s5 = inlined_call_operand.vmem [shape: f32[32,15], index: 5, kind: input, shape index: {}]   ;;  %s237_s6 = inlined_call_operand.vmem [shape: f32[1,15], index: 6, kind: input, shape index: {}]   ;;  %s238_s7 = inlined_call_operand.hbm [shape: f32[1,15], index: 7, kind: output, shape index: {}]  }
   0x1   :  { %v12_v0 = vstv %s232_s1 }
   0x2   :  { %13 = vst [vmem:[#allocation2] sm:$0x1] %v12_v0 }
   0x3   :  { %v31_v1 = vld [vmem:[%s233_s2 + $0x8] sm:$0x7f]  ;;  %vm45_vm0 = vcmask 1046528   ;;  %v30_v2 = vld [vmem:[%s233_s2] sm:$0xff]  ;;  %vm41_vm1 = vcmask 121856   ;;  %v153_v5 = vmov 0  }
   0x4   :  { %119 = vmatpush.msk.msra.mxu0 %vm45_vm0, %v31_v1  ;;  %v29_v3 = vld [vmem:[%s231_s0] sm:$0x1]  ;;  %124 = vset.pattern.permute.xlu0 %v153_v5 }
   0x9   :  { %v32_v4 = vld [vmem:[#allocation2] sm:$0x1] }
   0xa   :  { %14 = vsyncpa [#allocation4], 0  ;;  %64 = vmatpush.msra.mxu0 %v30_v2  ;;  %36 = vperm.xlu0 %124, %v32_v4   ;;  %v75_v6 = vld [vmem:[%s236_s5 + $0x18] sm:$0xff]  ;;  %v74_v7 = vld [vmem:[%s236_s5 + $0x10] sm:$0xff]  ;;  %vm77_vm2 = vcmask 261120   ;;  %s154_s19 = smov [#allocation3]  }
   0xb   :  { %120 = vmatmul.msk.f32.vlgmr.msra.gmra.mxu0 %vm41_vm1, %v29_v3  ;;  %93 = vmatpush.msra.mxu1 %v75_v6  ;;  %v73_v8 = vld [vmem:[%s236_s5 + $0x8] sm:$0xff]  ;;  %v72_v9 = vld [vmem:[%s236_s5] sm:$0xff]  ;;  %s108_s20 = sshll.u32 %s154_s19, 4  ;;  %s110_s22 = sshll.u32 %s238_s7, 4  ;;  %vm101_vm3 = vcmask 114688   ;;  %s109_s20 = int_to_ptr.vmem [resolvable:$true] %s108_s20  ;;  %s111_s22 = int_to_ptr.hbm [resolvable:$true] %s110_s22 }
   0xc   :  { %v33_v12 = vld [vmem:[%s234_s3] sm:$0x1] }
   0xd   :  { %94 = vmatpush.msra.mxu1 %v74_v7  ;;  %v69_v15 = vld [vmem:[%s235_s4] sm:$0x1] }
   0xe   :  { %v76_v19 = vld [vmem:[%s237_s6] sm:$0x1] }
   0xf   :  { %95 = vmatpush.msra.mxu1 %v73_v8 }
  0x11   :  { %96 = vmatpush.msra.mxu1 %v72_v9 }
  0x7c   :  { %v37_v10 = vpop.permute.xlu0 %36 }
  0x7d   :  { %v39_v11 = vperm.slane %v37_v10, 0 }
  0x7f   :  { %v40_v13 = vmul.f32 %v39_v11, %v33_v12 }
  0x88   :  { %v66_v14 = vpop.f32.mrf.mxu0 }
  0x89   :  { %v67_v16 = vadd.f32 %v66_v14, %v40_v13 }
  0x8b   :  { %v70_v17 = vadd.f32 %v69_v15, %v67_v16 }
  0x8d   :  { %125 = vtanh.f32 %v70_v17 }
  0x93   :  { %v126_v18 = vpop.eup %125 }
  0x94   :  { %121 = vmatmul.msk.f32.vlgmr.msra.gmra.mxu1 %vm77_vm2, %v126_v18 }
 0x111   :  { %v98_v20 = vpop.f32.mrf.mxu1 }
 0x112   :  { %v99_v21 = vadd.f32 %v98_v20, %v76_v19 }
 0x114   :  { %102 = vst.msk [vmem:[#allocation3] sm:$0x1] %vm101_vm3, %v99_v21 }
 0x115   :  { %113 = dma.vmem_to_hbm [thread:$0]  %s109_s20, 16, %s111_s22, [#allocation4]  }
 0x116   :  { %151 = dma.done.wait [#allocation4], 16  }
 0x117   :  { %152 = vsyncadd [#allocation4], 4294967280 }
 0x118   :  { %118 = vsyncpa [#allocation4], 1 }

</bundles_post_ra>
